<compile_context>
chip_gen: v7x
topology: tpu7x:2x2x1
jax: 0.10.0
libtpu: 0.0.40
codegen_flags: <defaults>
</compile_context>

<pallas_src>
import functools

import jax
import jax.numpy as jnp
import numpy as np
from jax.experimental import pallas as pl
from jax.experimental.pallas import tpu as pltpu


def _round_up(x, m):
    return (x + m - 1) // m * m


def _get_input_degrees(in_features):
    # torch.arange(1, in_features + 1)
    return jnp.arange(1, in_features + 1, dtype=jnp.int32)


def _hidden_out_degrees(out_features, autoregressive_features):
    max_ = max(1, autoregressive_features - 1)
    min_ = min(1, autoregressive_features - 1)
    return jnp.arange(out_features, dtype=jnp.int32) % max_ + min_


# ----------------------------- Pallas kernel --------------------------------
def masked_ff_kernel(in_deg_ref, x_ref, w_ref, b_ref, o_ref, acc_ref,
                     *, tn, min_deg, max_deg):
    k = pl.program_id(2)

    @pl.when(k == 0)
    def _():
        acc_ref[...] = jnp.zeros_like(acc_ref)

    # Build the autoregressive mask for this (tn, tk) weight tile from indices only.
    j = pl.program_id(1)
    row = j * tn + jax.lax.broadcasted_iota(jnp.int32, w_ref.shape, 0)   # (tn, tk)
    out_deg = row % max_deg + min_deg                                    # (tn, tk)
    mask = (out_deg >= in_deg_ref[...]).astype(jnp.float32)              # (tn, tk)

    # Mask in f32, feed the MXU in bf16, accumulate in f32.
    wm = (w_ref[...] * mask).astype(jnp.bfloat16)                        # (tn, tk)
    x = x_ref[...].astype(jnp.bfloat16)                                  # (tm, tk)
    acc_ref[...] += jax.lax.dot_general(
        x, wm, dimension_numbers=(((1,), (1,)), ((), ())),
        preferred_element_type=jnp.float32)                              # (tm, tn)

    @pl.when(k == pl.num_programs(2) - 1)
    def _():
        out = acc_ref[...] + b_ref[...]                                  # bias (1, tn)
        o_ref[...] = jnp.maximum(out, 0.0).astype(o_ref.dtype)


# ----------------------------- wrapper ---------------------------------------
def masked_feedforward_block(inputs, weight, bias, in_degrees,
                             autoregressive_features):
    """inputs: (B, F) f32; weight: (F, F) f32; bias: (F,) f32; in_degrees: (F,) int32."""
    B, F = inputs.shape
    assert weight.shape == (F, F) and bias.shape == (F,) and in_degrees.shape == (F,)

    max_deg = max(1, autoregressive_features - 1)
    min_deg = min(1, autoregressive_features - 1)

    # ---- padding to hardware-friendly shapes & tile selection ----------------
    F_pad = _round_up(F, 128)
    tm = 256 if B >= 256 else (128 if B >= 128 else _round_up(max(B, 1), 8))
    B_pad = _round_up(B, tm)
    tn = 256 if F_pad % 256 == 0 else 128
    tk = 512 if F_pad % 512 == 0 else (256 if F_pad % 256 == 0 else 128)

    x_p = jnp.zeros((B_pad, F_pad), jnp.float32).at[:B, :F].set(inputs)
    w_p = jnp.zeros((F_pad, F_pad), jnp.float32).at[:F, :F].set(weight)
    b_p = jnp.zeros((1, F_pad), jnp.float32).at[0, :F].set(bias)
    # Pad in_degrees with a sentinel larger than any out-degree -> mask == 0 there.
    sentinel = np.int32(autoregressive_features + F_pad + 1)
    d_p = jnp.full((1, F_pad), sentinel, jnp.int32).at[0, :F].set(
        in_degrees.astype(jnp.int32))

    grid = (B_pad // tm, F_pad // tn, F_pad // tk)

    # VMEM budget: double-buffered tiles + accumulator, with headroom.
    est = 2 * (tm * tk * 4 + tn * tk * 4 + tk * 4 + tn * 4 + tm * tn * 4) + tm * tn * 4
    vmem_limit = int(min(32 * 1024 * 1024, max(4 * 1024 * 1024, 4 * est)))

    kernel = functools.partial(masked_ff_kernel, tn=tn,
                               min_deg=min_deg, max_deg=max_deg)

    out_p = pl.pallas_call(
        kernel,
        out_shape=jax.ShapeDtypeStruct((B_pad, F_pad), jnp.float32),
        grid_spec=pltpu.PrefetchScalarGridSpec(
            num_scalar_prefetch=0,
            grid=grid,
            in_specs=[
                pl.BlockSpec((1, tk), lambda i, j, k: (0, k)),    # in_degrees (int32)
                pl.BlockSpec((tm, tk), lambda i, j, k: (i, k)),   # x
                pl.BlockSpec((tn, tk), lambda i, j, k: (j, k)),   # weight
                pl.BlockSpec((1, tn), lambda i, j, k: (0, j)),    # bias
            ],
            out_specs=pl.BlockSpec((tm, tn), lambda i, j, k: (i, j)),
            scratch_shapes=[pltpu.VMEM((tm, tn), jnp.float32)],
        ),
        compiler_params=pltpu.CompilerParams(
            dimension_semantics=("parallel", "parallel", "arbitrary"),
            vmem_limit_bytes=vmem_limit,
        ),
    )(d_p, x_p, w_p, b_p)

    return out_p[:B, :F]


# ----------------------------- reference (plain JAX, f32) --------------------
def masked_feedforward_block_ref(inputs, weight, bias, in_degrees,
                                 autoregressive_features):
    F = weight.shape[0]
    out_degrees = _hidden_out_degrees(F, autoregressive_features)
    mask = (out_degrees[:, None] >= in_degrees[None, :]).astype(jnp.float32)
    return jax.nn.relu(inputs @ (weight * mask).T + bias)


def _run_case(key, batch, features, autoregressive_features):
    kx, kw, kb = jax.random.split(key, 3)
    bound = 1.0 / np.sqrt(features)
    weight = jax.random.uniform(kw, (features, features), jnp.float32, -bound, bound)
    bias = jax.random.uniform(kb, (features,), jnp.float32, -bound, bound)
    in_degrees = _get_input_degrees(features)
    inputs = jax.random.normal(kx, (batch, features), jnp.float32)

    out = masked_feedforward_block(inputs, weight, bias, in_degrees,
                                   autoregressive_features)
    out = jax.block_until_ready(out)

    ref = masked_feedforward_block_ref(inputs, weight, bias, in_degrees,
                                       autoregressive_features)
    # bf16 MXU operands with f32 accumulation -> loosened tolerance vs f32 reference.
    np.testing.assert_allclose(np.asarray(out), np.asarray(ref), rtol=5e-2, atol=5e-2)


if __name__ == "__main__":
    key = jax.random.PRNGKey(0)
    k1, k2 = jax.random.split(key)

    # Small case consistent with the module (single-tile grid).
    _run_case(k1, batch=8, features=32, autoregressive_features=32)

    # Slightly larger case exercising the multi-tile K-reduction + padding path.
    _run_case(k2, batch=20, features=300, autoregressive_features=300)

    # TODO(synk): BatchNorm1d (use_batch_norm=True) and dropout>0 training-mode paths are
    # not implemented; module defaults (no BN, dropout=0 eval) are matched exactly.
    print("KERNEL_OK")
</pallas_src>

<mosaic_0001>
module attributes {stable_mosaic.version = 11 : i64} {
  func.func @masked_ff_kernel(%arg0: i32, %arg1: i32, %arg2: i32, %arg3: memref<1x128xi32, #tpu.memory_space<vmem>>, %arg4: memref<8x128xf32, #tpu.memory_space<vmem>>, %arg5: memref<128x128xf32, #tpu.memory_space<vmem>>, %arg6: memref<1x128xf32, #tpu.memory_space<vmem>>, %arg7: memref<8x128xf32, #tpu.memory_space<vmem>>, %arg8: memref<8x128xf32, #tpu.memory_space<vmem>>) attributes {dimension_semantics = [#tpu.dimension_semantics<parallel>, #tpu.dimension_semantics<parallel>, #tpu.dimension_semantics<arbitrary>], iteration_bounds = array<i64: 1, 1, 1>, scalar_prefetch = 0 : i64, scratch_operands = 1 : i64, tpu.core_type = #tpu.core_type<tc>, window_params = [{transform_indices = @transform_0, window_bounds = array<i64: 1, 128>}, {transform_indices = @transform_1, window_bounds = array<i64: 8, 128>}, {transform_indices = @transform_2, window_bounds = array<i64: 128, 128>}, {transform_indices = @transform_3, window_bounds = array<i64: 1, 128>}, {transform_indices = @transform_4, window_bounds = array<i64: 8, 128>}]} {
    %c0_i32 = arith.constant 0 : i32
    %0 = arith.cmpi eq, %arg2, %c0_i32 : i32
    %1 = arith.extui %0 : i1 to i32
    %c0_i32_0 = arith.constant 0 : i32
    %2 = arith.cmpi ne, %1, %c0_i32_0 : i32
    scf.if %2 {
      %cst_17 = arith.constant 0.000000e+00 : f32
      %42 = vector.broadcast %cst_17 : f32 to vector<8x128xf32>
      %c0_18 = arith.constant 0 : index
      %c0_19 = arith.constant 0 : index
      %43 = vector.load %arg8[%c0_18, %c0_19] : memref<8x128xf32, #tpu.memory_space<vmem>>, vector<8x128xf32>
      tpu.vector_store %arg8[%c0_18, %c0_19], %42 {strides = array<i32>} : memref<8x128xf32, #tpu.memory_space<vmem>>, vector<8x128xf32>,
    } else {
    }
    %c128_i32 = arith.constant 128 : i32
    %3 = arith.muli %arg1, %c128_i32 : i32
    %4 = tpu.iota {dimensions = array<i32: 0>} : vector<128x128xi32>
    %5 = vector.broadcast %3 : i32 to vector<128x128xi32>
    %6 = arith.addi %5, %4 : vector<128x128xi32>
    %c31_i32 = arith.constant 31 : i32
    %c0_i32_1 = arith.constant 0 : i32
    %7 = arith.cmpi eq, %c31_i32, %c0_i32_1 : i32
    %c1_i32 = arith.constant 1 : i32
    %8 = arith.select %7, %c1_i32, %c31_i32 : i32
    %9 = vector.broadcast %8 : i32 to vector<128x128xi32>
    %10 = arith.remsi %6, %9 : vector<128x128xi32>
    %c0_i32_2 = arith.constant 0 : i32
    %11 = vector.broadcast %c0_i32_2 : i32 to vector<128x128xi32>
    %12 = arith.cmpi ne, %10, %11 : vector<128x128xi32>
    %c0_i32_3 = arith.constant 0 : i32
    %13 = vector.broadcast %c0_i32_3 : i32 to vector<128x128xi32>
    %14 = arith.cmpi slt, %10, %13 : vector<128x128xi32>
    %c0_i32_4 = arith.constant 0 : i32
    %15 = arith.cmpi slt, %8, %c0_i32_4 : i32
    %16 = vector.broadcast %15 : i1 to vector<128x128xi1>
    %17 = vector.broadcast %16 : vector<128x128xi1> to vector<128x128xi1>
    %18 = arith.xori %14, %17 : vector<128x128xi1>
    %19 = arith.andi %18, %12 : vector<128x128xi1>
    %20 = vector.broadcast %8 : i32 to vector<128x128xi32>
    %21 = arith.addi %10, %20 : vector<128x128xi32>
    %22 = arith.select %19, %21, %10 : vector<128x128xi1>, vector<128x128xi32>
    %c1_i32_5 = arith.constant 1 : i32
    %23 = vector.broadcast %c1_i32_5 : i32 to vector<128x128xi32>
    %24 = arith.addi %22, %23 : vector<128x128xi32>
    %c0 = arith.constant 0 : index
    %c0_6 = arith.constant 0 : index
    %25 = vector.load %arg3[%c0, %c0_6] : memref<1x128xi32, #tpu.memory_space<vmem>>, vector<1x128xi32>
    %26 = vector.broadcast %25 : vector<1x128xi32> to vector<128x128xi32>
    %27 = arith.cmpi sge, %24, %26 : vector<128x128xi32>
    %28 = arith.extui %27 : vector<128x128xi1> to vector<128x128xi32>
    %29 = arith.sitofp %28 : vector<128x128xi32> to vector<128x128xf32>
    %c0_7 = arith.constant 0 : index
    %c0_8 = arith.constant 0 : index
    %30 = vector.load %arg5[%c0_7, %c0_8] : memref<128x128xf32, #tpu.memory_space<vmem>>, vector<128x128xf32>
    %31 = arith.mulf %30, %29 : vector<128x128xf32>
    %32 = arith.truncf %31 : vector<128x128xf32> to vector<128x128xbf16>
    %c0_9 = arith.constant 0 : index
    %c0_10 = arith.constant 0 : index
    %33 = vector.load %arg4[%c0_9, %c0_10] : memref<8x128xf32, #tpu.memory_space<vmem>>, vector<8x128xf32>
    %34 = arith.truncf %33 : vector<8x128xf32> to vector<8x128xbf16>
    %c0_11 = arith.constant 0 : index
    %c0_12 = arith.constant 0 : index
    %35 = vector.load %arg8[%c0_11, %c0_12] : memref<8x128xf32, #tpu.memory_space<vmem>>, vector<8x128xf32>
    %cst = arith.constant dense<0.000000e+00> : vector<8x128xf32>
    %36 = tpu.matmul %34, %32, %cst {dimension_numbers = #tpu.dot_dimension_numbers<[1], [1], [0], [0], [0, 0, 1, 0], [], []>} : vector<8x128xbf16>, vector<128x128xbf16>, vector<8x128xf32> -> vector<8x128xf32>
    %37 = arith.addf %35, %36 : vector<8x128xf32>
    %c0_13 = arith.constant 0 : index
    %c0_14 = arith.constant 0 : index
    %38 = vector.load %arg8[%c0_13, %c0_14] : memref<8x128xf32, #tpu.memory_space<vmem>>, vector<8x128xf32>
    tpu.vector_store %arg8[%c0_13, %c0_14], %37 {strides = array<i32>} : memref<8x128xf32, #tpu.memory_space<vmem>>, vector<8x128xf32>,
    %c0_i32_15 = arith.constant 0 : i32
    %39 = arith.cmpi eq, %arg2, %c0_i32_15 : i32
    %40 = arith.extui %39 : i1 to i32
    %c0_i32_16 = arith.constant 0 : i32
    %41 = arith.cmpi ne, %40, %c0_i32_16 : i32
    scf.if %41 {
      %c0_17 = arith.constant 0 : index
      %c0_18 = arith.constant 0 : index
      %42 = vector.load %arg8[%c0_17, %c0_18] : memref<8x128xf32, #tpu.memory_space<vmem>>, vector<8x128xf32>
      %c0_19 = arith.constant 0 : index
      %c0_20 = arith.constant 0 : index
      %43 = vector.load %arg6[%c0_19, %c0_20] : memref<1x128xf32, #tpu.memory_space<vmem>>, vector<1x128xf32>
      %44 = vector.broadcast %43 : vector<1x128xf32> to vector<8x128xf32>
      %45 = arith.addf %42, %44 : vector<8x128xf32>
      %cst_21 = arith.constant 0.000000e+00 : f32
      %46 = vector.broadcast %cst_21 : f32 to vector<8x128xf32>
      %47 = arith.maximumf %45, %46 : vector<8x128xf32>
      %c0_22 = arith.constant 0 : index
      %c0_23 = arith.constant 0 : index
      %48 = vector.load %arg7[%c0_22, %c0_23] : memref<8x128xf32, #tpu.memory_space<vmem>>, vector<8x128xf32>
      tpu.vector_store %arg7[%c0_22, %c0_23], %47 {strides = array<i32>} : memref<8x128xf32, #tpu.memory_space<vmem>>, vector<8x128xf32>,
    } else {
    }
    return
  }
  func.func @transform_0(%arg0: i32, %arg1: i32, %arg2: i32) -> (i32, i32) {
    %c0_i32 = arith.constant 0 : i32
    %c0_i32_0 = arith.constant 0 : i32
    return %c0_i32, %arg2 : i32, i32
  }
  func.func @transform_1(%arg0: i32, %arg1: i32, %arg2: i32) -> (i32, i32) {
    %c0_i32 = arith.constant 0 : i32
    return %arg0, %arg2 : i32, i32
  }
  func.func @transform_2(%arg0: i32, %arg1: i32, %arg2: i32) -> (i32, i32) {
    %c0_i32 = arith.constant 0 : i32
    return %arg1, %arg2 : i32, i32
  }
  func.func @transform_3(%arg0: i32, %arg1: i32, %arg2: i32) -> (i32, i32) {
    %c0_i32 = arith.constant 0 : i32
    %c0_i32_0 = arith.constant 0 : i32
    return %c0_i32, %arg1 : i32, i32
  }
  func.func @transform_4(%arg0: i32, %arg1: i32, %arg2: i32) -> (i32, i32) {
    %c0_i32 = arith.constant 0 : i32
    return %arg0, %arg1 : i32, i32
  }
}

</mosaic_0001>

<bundles_post_ra>
// kernel: tpu_custom_call.1
= control target key start
LH: loop header
LB: loop body
LE: loop exit
PB: predicated region body
PF: predicated region fallthrough
CT: control target
= control target key end

     0   :  { %9 = vsyncpa [#allocation4], 0  ;;  %s1038_s0 = inlined_call_operand.hbm [shape: s32[1,128], index: 0, kind: input, shape index: {}]   ;;  %s1039_s1 = inlined_call_operand.hbm [shape: f32[8,128], index: 1, kind: input, shape index: {}]   ;;  %s1040_s2 = inlined_call_operand.hbm [shape: f32[128,128], index: 2, kind: input, shape index: {}]   ;;  %s1041_s3 = inlined_call_operand.vmem [shape: f32[1,128], index: 3, kind: input, shape index: {}]   ;;  %s1042_s4 = inlined_call_operand.hbm [shape: f32[8,128], index: 4, kind: output, shape index: {}]  }
   0x1   :  { %10 = vsyncpa [#allocation7], 0 }
   0x2   :  { %11 = vsyncpa [#allocation5], 0  ;;  %s766_s15 = smov [#allocation6]   ;;  %s767_s17 = smov [#allocation3]  }
   0x3   :  { %s28_s16 = sshll.u32 %s766_s15, 4  ;;  %s18_s18 = sshll.u32 %s767_s17, 4  ;;  %s29_s16 = int_to_ptr.vmem [resolvable:$true] %s28_s16  ;;  %s19_s18 = int_to_ptr.vmem [resolvable:$true] %s18_s18 }
   0x4   :  { %s672_s21 = scalar_lea.hbm %s1039_s1, 128 }
   0x5   :  { %p673_p0 = scmp.ne.s32.totalorder %s1039_s1, %s672_s21  ;;  %p676_p1 = scmp.lt.u32.totalorder %s672_s21, %s1039_s1 }
   0x7   :  { %p678_p2 = pnand %p676_p1, %p673_p0 }
   0x9   :  { %681 = shalt.err (!%p678_p2)
}
   0xa   :  { %s682_s26 = scalar_lea.vmem %s29_s16, 128  ;;  %p687_p4 = scmp.lt.s32.totalorder %s29_s16, %s29_s16 }
   0xb   :  { %p683_p3 = scmp.ne.s32.totalorder %s29_s16, %s682_s26  ;;  %p688_p5 = scmp.lt.s32.totalorder %s682_s26, %s682_s26 }
   0xd   :  { %p689_p6 = por %p688_p5, %p687_p4 }
   0xf   :  { %p690_p7 = pnand %p689_p6, %p683_p3 }
  0x11   :  { %693 = shalt.err (!%p690_p7)
}
  0x12   :  { %31 = dma.hbm_to_vmem [thread:$0]  %s1039_s1, 128, %s29_s16, [#allocation7]  }
  0x13   :  { %s694_s5 = scalar_lea.hbm %s1038_s0, 16 }
  0x14   :  { %p695_p8 = scmp.ne.s32.totalorder %s1038_s0, %s694_s5  ;;  %p698_p9 = scmp.lt.u32.totalorder %s694_s5, %s1038_s0 }
  0x16   :  { %p700_p10 = pnand %p698_p9, %p695_p8 }
  0x18   :  { %703 = shalt.err (!%p700_p10)
}
  0x19   :  { %s704_s10 = scalar_lea.vmem %s19_s18, 16  ;;  %s708_s11 = scalar_lea.vmem %s19_s18, 32 }
  0x1a   :  { %p705_p11 = scmp.ne.s32.totalorder %s19_s18, %s704_s10  ;;  %p709_p12 = scmp.lt.s32.totalorder %s19_s18, %s19_s18 }
  0x1b   :  { %p710_p13 = scmp.lt.s32.totalorder %s708_s11, %s704_s10 }
  0x1d   :  { %p711_p0 = por %p710_p13, %p709_p12 }
  0x1f   :  { %p712_p1 = pnand %p711_p0, %p705_p11 }
  0x21   :  { %715 = shalt.err (!%p712_p1)
}
  0x22   :  { %21 = dma.hbm_to_vmem [thread:$0]  %s1038_s0, 16, %s19_s18, [#allocation4]  }
  0x23   :  { %s768_s13 = smov [#allocation8]   ;;  %s716_s17 = scalar_lea.hbm %s1040_s2, 2048 }
  0x24   :  { %s37_s14 = sshll.u32 %s768_s13, 4  ;;  %p717_p2 = scmp.ne.s32.totalorder %s1040_s2, %s716_s17  ;;  %s38_s14 = int_to_ptr.vmem [resolvable:$true] %s37_s14 }
  0x25   :  { %p720_p3 = scmp.lt.u32.totalorder %s716_s17, %s1040_s2 }
  0x27   :  { %p722_p4 = pnand %p720_p3, %p717_p2 }
  0x29   :  { %725 = shalt.err (!%p722_p4)
}
  0x2a   :  { %s726_s23 = scalar_lea.vmem %s38_s14, 2048  ;;  %p731_p6 = scmp.lt.s32.totalorder %s38_s14, %s38_s14 }
  0x2b   :  { %p727_p5 = scmp.ne.s32.totalorder %s38_s14, %s726_s23  ;;  %p732_p7 = scmp.lt.s32.totalorder %s726_s23, %s726_s23 }
  0x2d   :  { %p733_p8 = por %p732_p7, %p731_p6 }
  0x2f   :  { %p734_p9 = pnand %p733_p8, %p727_p5 }
  0x31   :  { %737 = shalt.err (!%p734_p9)
}
  0x32   :  { %s769_s0 = smov 128   ;;  %s770_s18 = smov 8  }
  0x33   :  { %43 = dma.hbm_to_vmem [thread:$0]  %s1040_s2, 2048, %s38_s14, [#allocation7], %s769_s0, %s769_s0, %s770_s18  }
  0x34   :  { %760 = dma.done.wait [#allocation4], 16  }
  0x35   :  { %761 = vsyncadd [#allocation4], 4294967280 }
  0x36   :  { %762 = dma.done.wait [#allocation7], 2176  }
  0x37   :  { %763 = vsyncadd [#allocation7], 4294965120  ;;  %v62_v0 = vlaneseq  ;;  %v771_v1 = vmov 0.0   ;;  %vm772_vm0 = vmmov 0   ;;  %v773_v10 = vmov 0   ;;  %v469_v54 = vld [vmem:[#allocation8] sm:$0xff] }
  0x38   :  { %611 = vmatprep.subr.bf16.mxu0 %v771_v1  ;;  %627 = vmatprep.mubr.msk.bf16.mxu0 %vm772_vm0, %v771_v1  ;;  %v888_v48 = vld [vmem:[#allocation3] ss:$0 sm:$0xff]  ;;  %v470_v60 = vld [vmem:[#allocation8 + $0x8] sm:$0xff]  ;;  %s774_s27 = smov [#allocation9]  }
  0x39   :  { %v838_v2 = vshrl.u32 %v62_v0, 7  ;;  %s574_s28 = sshll.u32 %s774_s27, 4  ;;  %s575_s28 = int_to_ptr.vmem [resolvable:$true] %s574_s28 }
  0x3a   :  { %s738_s29 = scalar_lea.vmem %s575_s28, 128  ;;  %p743_p11 = scmp.lt.s32.totalorder %s575_s28, %s575_s28 }
  0x3b   :  { %v64_v3 = vadd.s32 8, %v838_v2  ;;  %v842_v4 = vmul.u32.u64.low 2216757314, %v838_v2  ;;  %v843_v5 = vmul.u32.u64.high 2216757314, %v838_v2, %v842_v4  ;;  %v65_v6 = vadd.s32 16, %v838_v2  ;;  %p739_p10 = scmp.ne.s32.totalorder %s575_s28, %s738_s29  ;;  %p744_p12 = scmp.lt.s32.totalorder %s738_s29, %s738_s29 }
  0x3c   :  { %v66_v7 = vadd.s32 24, %v838_v2  ;;  %v852_v12 = vadd.s32 32, %v838_v2  ;;  %v863_v19 = vadd.s32 40, %v838_v2  ;;  %v867_v22 = vadd.s32 48, %v838_v2 }
  0x3d   :  { %vm102_vm1 = vc.u32 %v842_v4, 2216757314  ;;  %v847_v8 = vmul.u32.u64.low 2216757314, %v64_v3  ;;  %v848_v9 = vmul.u32.u64.high 2216757314, %v64_v3, %v847_v8  ;;  %v885_v39 = vadd.s32 56, %v838_v2  ;;  %p745_p13 = por %p744_p12, %p743_p11 }
  0x3e   :  { %v103_v11 = vsel %vm102_vm1, 1, %v773_v10  ;;  %v855_v14 = vmul.u32.u64.low 2216757314, %v65_v6  ;;  %v856_v15 = vmul.u32.u64.high 2216757314, %v65_v6, %v855_v14 }
  0x3f   :  { %v104_v13 = vadd.s32 %v843_v5, %v103_v11  ;;  %vm116_vm2 = vc.u32 %v847_v8, 2216757314  ;;  %v859_v17 = vmul.u32.u64.low 2216757314, %v66_v7  ;;  %v860_v18 = vmul.u32.u64.high 2216757314, %v66_v7, %v859_v17  ;;  %v471_v11 = vld [vmem:[#allocation8 + $0x10] sm:$0xff]  ;;  %p746_p0 = pnand %p745_p13, %p739_p10 }
  0x40   :  { %v117_v16 = vsel %vm116_vm2, 1, %v773_v10  ;;  %vm130_vm3 = vc.u32 %v855_v14, 2216757314  ;;  %v871_v24 = vmul.u32.u64.low 2216757314, %v852_v12  ;;  %v872_v25 = vmul.u32.u64.high 2216757314, %v852_v12, %v871_v24 }
  0x41   :  { %v105_v20 = vshrl.u32 %v104_v13, 4  ;;  %v118_v21 = vadd.s32 %v848_v9, %v117_v16  ;;  %v131_v23 = vsel %vm130_vm3, 1, %v773_v10  ;;  %vm144_vm4 = vc.u32 %v859_v17, 2216757314  ;;  %v472_v16 = vld [vmem:[#allocation8 + $0x18] sm:$0xff] }
  0x42   :  { %v132_v28 = vadd.s32 %v856_v15, %v131_v23  ;;  %v145_v29 = vsel %vm144_vm4, 1, %v773_v10  ;;  %vm158_vm5 = vc.u32 %v871_v24, 2216757314  ;;  %v904_v17 = vadd.s32 64, %v838_v2 }
  0x43   :  { %v106_v26 = vmul.u32 31, %v105_v20  ;;  %v119_v27 = vshrl.u32 %v118_v21, 4  ;;  %v146_v30 = vadd.s32 %v860_v18, %v145_v29  ;;  %v159_v36 = vsel %vm158_vm5, 1, %v773_v10 }
  0x44   :  { %v878_v31 = vmul.u32.u64.low 2216757314, %v863_v19  ;;  %v879_v32 = vmul.u32.u64.high 2216757314, %v863_v19, %v878_v31  ;;  %v133_v35 = vshrl.u32 %v132_v28, 4  ;;  %v160_v38 = vadd.s32 %v872_v25, %v159_v36 }
  0x45   :  { %v107_v33 = vsub.s32 %v838_v2, %v106_v26  ;;  %v120_v34 = vmul.u32 31, %v119_v27  ;;  %v147_v37 = vshrl.u32 %v146_v30, 4 }
  0x46   :  { %vm172_vm6 = vc.u32 %v878_v31, 2216757314  ;;  %v134_v42 = vmul.u32 31, %v133_v35  ;;  %v161_v44 = vshrl.u32 %v160_v38, 4  ;;  %v922_v35 = vadd.s32 80, %v838_v2 }
  0x47   :  { %v121_v40 = vsub.s32 %v64_v3, %v120_v34  ;;  %vm320_vm7 = vcmp.ne.s32.totalorder %v107_v33, 0  ;;  %vm336_vm8 = vcmp.lt.s32.totalorder %v107_v33, 0  ;;  %v368_v41 = vadd.s32 31, %v107_v33 }
  0x48   :  { %vm352_vm9 = vmand %vm336_vm8, %vm320_vm7  ;;  %v148_v43 = vmul.u32 31, %v147_v37  ;;  %v173_v45 = vsel %vm172_vm6, 1, %v773_v10  ;;  %v135_v50 = vsub.s32 %v65_v6, %v134_v42  ;;  %v162_v52 = vmul.u32 31, %v161_v44 }
  0x49   :  { %vm321_vm10 = vcmp.ne.s32.totalorder %v121_v40, 0  ;;  %vm337_vm11 = vcmp.lt.s32.totalorder %v121_v40, 0  ;;  %v369_v46 = vadd.s32 31, %v121_v40  ;;  %v384_v47 = vsel %vm352_vm9, %v368_v41, %v107_v33  ;;  %v473_v33 = vld [vmem:[#allocation8 + $0x20] sm:$0xff] }
  0x4a   :  { %vm353_vm12 = vmand %vm337_vm11, %vm321_vm10  ;;  %v400_v49 = vadd.s32 1, %v384_v47  ;;  %v149_v51 = vsub.s32 %v66_v7, %v148_v43  ;;  %v174_v55 = vadd.s32 %v879_v32, %v173_v45  ;;  %vm322_vm14 = vcmp.ne.s32.totalorder %v135_v50, 0 }
  0x4b   :  { %v385_v53 = vsel %vm353_vm12, %v369_v46, %v121_v40  ;;  %v892_v56 = vmul.u32.u64.low 2216757314, %v867_v22  ;;  %v893_v57 = vmul.u32.u64.high 2216757314, %v867_v22, %v892_v56  ;;  %vm338_vm0 = vcmp.lt.s32.totalorder %v135_v50, 0  ;;  %v474_v40 = vld [vmem:[#allocation8 + $0x28] sm:$0xff] }
  0x4c   :  { %v401_v58 = vadd.s32 1, %v385_v53  ;;  %vm421_vm13 = vcmp.ge.s32.totalorder %v400_v49, %v888_v48  ;;  %vm323_vm15 = vcmp.ne.s32.totalorder %v149_v51, 0  ;;  %vm339_vm1 = vcmp.lt.s32.totalorder %v149_v51, 0  ;;  %vm354_vm3 = vmand %vm338_vm0, %vm322_vm14 }
  0x4d   :  { %v585_v59 = vsel %vm421_vm13, 1.0, %v771_v1  ;;  %v370_v61 = vadd.s32 31, %v135_v50  ;;  %v371_v63 = vadd.s32 31, %v149_v51  ;;  %v163_v0 = vsub.s32 %v852_v12, %v162_v52  ;;  %vm355_vm4 = vmand %vm339_vm1, %vm323_vm15 }
  0x4e   :  { %vm422_vm2 = vcmp.ge.s32.totalorder %v401_v58, %v888_v48  ;;  %v485_v62 = vmul.f32 %v585_v59, %v469_v54  ;;  %v175_v5 = vshrl.u32 %v174_v55, 4  ;;  %vm186_vm5 = vc.u32 %v892_v56, 2216757314 }
  0x4f   :  { %v586_v3 = vsel %vm422_vm2, 1.0, %v771_v1  ;;  %v386_v4 = vsel %vm354_vm3, %v370_v61, %v135_v50  ;;  %v387_v7 = vsel %vm355_vm4, %v371_v63, %v149_v51  ;;  %vm324_vm6 = vcmp.ne.s32.totalorder %v163_v0, 0 }
  0x50   :  { %v486_v6 = vmul.f32 %v586_v3, %v470_v60  ;;  %v402_v8 = vadd.s32 1, %v386_v4  ;;  %v403_v9 = vadd.s32 1, %v387_v7  ;;  %v176_v13 = vmul.u32 31, %v175_v5 }
  0x51   :  { %vm340_vm7 = vcmp.lt.s32.totalorder %v163_v0, 0  ;;  %v372_v14 = vadd.s32 31, %v163_v0  ;;  %v187_v12 = vsel %vm186_vm5, 1, %v773_v10  ;;  %v919_v34 = vadd.s32 72, %v838_v2 }
  0x52   :  { %v501_v15 = vpack.c.bf16 %v486_v6, %v485_v62  ;;  %vm423_vm8 = vcmp.ge.s32.totalorder %v402_v8, %v888_v48  ;;  %vm356_vm9 = vmand %vm340_vm7, %vm324_vm6  ;;  %vm424_vm10 = vcmp.ge.s32.totalorder %v403_v9, %v888_v48  ;;  %v177_v20 = vsub.s32 %v863_v19, %v176_v13  ;;  %v475_v6 = vld [vmem:[#allocation8 + $0x30] sm:$0xff] }
  0x53   :  { %v587_v18 = vsel %vm423_vm8, 1.0, %v771_v1  ;;  %v388_v21 = vsel %vm356_vm9, %v372_v14, %v163_v0  ;;  %v588_v23 = vsel %vm424_vm10, 1.0, %v771_v1  ;;  %v188_v26 = vadd.s32 %v893_v57, %v187_v12 }
  0x54   :  { %612 = vmatpush3.bf16.xpose.msra.mxu0 %v501_v15  ;;  %v487_v24 = vmul.f32 %v587_v18, %v471_v11  ;;  %v404_v25 = vadd.s32 1, %v388_v21  ;;  %v488_v27 = vmul.f32 %v588_v23, %v472_v16  ;;  %vm325_vm11 = vcmp.ne.s32.totalorder %v177_v20, 0 }
  0x55   :  { %613 = vmatprep.subr.bf16.mxu0 %v771_v1  ;;  %vm341_vm12 = vcmp.lt.s32.totalorder %v177_v20, 0  ;;  %v373_v28 = vadd.s32 31, %v177_v20  ;;  %v189_v29 = vshrl.u32 %v188_v26, 4  ;;  %v930_v44 = vadd.s32 88, %v838_v2 }
  0x56   :  { %vm357_vm13 = vmand %vm341_vm12, %vm325_vm11  ;;  %vm425_vm14 = vcmp.ge.s32.totalorder %v404_v25, %v888_v48  ;;  %v914_v19 = vmul.u32.u64.low 2216757314, %v885_v39  ;;  %v915_v30 = vmul.u32.u64.high 2216757314, %v885_v39, %v914_v19  ;;  %v502_v36 = vpack.c.bf16 %v488_v27, %v487_v24  ;;  %v476_v25 = vld [vmem:[#allocation8 + $0x38] sm:$0xff] }
  0x57   :  { %v389_v31 = vsel %vm357_vm13, %v373_v28, %v177_v20  ;;  %v589_v32 = vsel %vm425_vm14, 1.0, %v771_v1  ;;  %v190_v38 = vmul.u32 31, %v189_v29  ;;  %v943_v55 = vadd.s32 96, %v838_v2 }
  0x58   :  { %v405_v37 = vadd.s32 1, %v389_v31  ;;  %vm200_vm15 = vc.u32 %v914_v19, 2216757314  ;;  %v926_v42 = vmul.u32.u64.low 2216757314, %v904_v17  ;;  %v927_v43 = vmul.u32.u64.high 2216757314, %v904_v17, %v926_v42 }
  0x59   :  { %v201_v41 = vsel %vm200_vm15, 1, %v773_v10  ;;  %v489_v45 = vmul.f32 %v589_v32, %v473_v33  ;;  %v191_v46 = vsub.s32 %v867_v22, %v190_v38  ;;  %v948_v59 = vadd.s32 104, %v838_v2 }
  0x5a   :  { %vm426_vm0 = vcmp.ge.s32.totalorder %v405_v37, %v888_v48  ;;  %v202_v47 = vadd.s32 %v915_v30, %v201_v41  ;;  %vm214_vm1 = vc.u32 %v926_v42, 2216757314  ;;  %v977_v38 = vadd.s32 112, %v838_v2 }
  0x5b   :  { %v590_v49 = vsel %vm426_vm0, 1.0, %v771_v1  ;;  %v937_v50 = vmul.u32.u64.low 2216757314, %v919_v34  ;;  %v938_v51 = vmul.u32.u64.high 2216757314, %v919_v34, %v937_v50  ;;  %vm326_vm2 = vcmp.ne.s32.totalorder %v191_v46, 0 }
  0x5c   :  { %614 = vmatpush3.bf16.xpose.msra.mxu0 %v502_v36  ;;  %v490_v52 = vmul.f32 %v590_v49, %v474_v40  ;;  %v203_v53 = vshrl.u32 %v202_v47, 4  ;;  %vm342_vm3 = vcmp.lt.s32.totalorder %v191_v46, 0  ;;  %v374_v54 = vadd.s32 31, %v191_v46 }
  0x5d   :  { %615 = vmatprep.subr.bf16.mxu0 %v771_v1  ;;  %vm358_vm4 = vmand %vm342_vm3, %vm326_vm2  ;;  %v215_v22 = vsel %vm214_vm1, 1, %v773_v10  ;;  %vm228_vm5 = vc.u32 %v937_v50, 2216757314  ;;  %v952_v62 = vmul.u32.u64.low 2216757314, %v922_v35  ;;  %v953_v63 = vmul.u32.u64.high 2216757314, %v922_v35, %v952_v62 }
  0x5e   :  { %v204_v56 = vmul.u32 31, %v203_v53  ;;  %v216_v57 = vadd.s32 %v927_v43, %v215_v22  ;;  %v229_v58 = vsel %vm228_vm5, 1, %v773_v10  ;;  %v390_v60 = vsel %vm358_vm4, %v374_v54, %v191_v46  ;;  %v478_v46 = vld [vmem:[#allocation8 + $0x48] sm:$0xff] }
  0x5f   :  { %v230_v61 = vadd.s32 %v938_v51, %v229_v58  ;;  %v503_v0 = vpack.c.bf16 %v490_v52, %v489_v45  ;;  %v406_v4 = vadd.s32 1, %v390_v60  ;;  %vm242_vm6 = vc.u32 %v952_v62, 2216757314  ;;  %v477_v45 = vld [vmem:[#allocation8 + $0x40] sm:$0xff] }
  0x60   :  { %v205_v3 = vsub.s32 %v885_v39, %v204_v56  ;;  %v217_v5 = vshrl.u32 %v216_v57, 4  ;;  %v957_v8 = vmul.u32.u64.low 2216757314, %v930_v44  ;;  %v958_v9 = vmul.u32.u64.high 2216757314, %v930_v44, %v957_v8 }
  0x61   :  { %v231_v7 = vshrl.u32 %v230_v61, 4  ;;  %vm427_vm9 = vcmp.ge.s32.totalorder %v406_v4, %v888_v48  ;;  %v243_v39 = vsel %vm242_vm6, 1, %v773_v10  ;;  %v479_v4 = vld [vmem:[#allocation8 + $0x50] sm:$0xff] }
  0x62   :  { %vm327_vm7 = vcmp.ne.s32.totalorder %v205_v3, 0  ;;  %vm343_vm8 = vcmp.lt.s32.totalorder %v205_v3, 0  ;;  %v375_v11 = vadd.s32 31, %v205_v3  ;;  %v591_v13 = vsel %vm427_vm9, 1.0, %v771_v1 }
  0x63   :  { %vm359_vm10 = vmand %vm343_vm8, %vm327_vm7  ;;  %v218_v14 = vmul.u32 31, %v217_v5  ;;  %v232_v15 = vmul.u32 31, %v231_v7  ;;  %v491_v12 = vmul.f32 %v591_v13, %v475_v6  ;;  %v244_v18 = vadd.s32 %v953_v63, %v243_v39  ;;  %v480_v13 = vld [vmem:[#allocation8 + $0x58] sm:$0xff] }
  0x64   :  { %616 = vmatpush3.bf16.xpose.msra.mxu0 %v503_v0  ;;  %v391_v16 = vsel %vm359_vm10, %v375_v11, %v205_v3  ;;  %vm256_vm11 = vc.u32 %v957_v8, 2216757314  ;;  %v970_v28 = vmul.u32.u64.low 2216757314, %v943_v55  ;;  %v971_v29 = vmul.u32.u64.high 2216757314, %v943_v55, %v970_v28 }
  0x65   :  { %617 = vmatprep.subr.bf16.mxu0 %v771_v1  ;;  %v407_v20 = vadd.s32 1, %v391_v16  ;;  %v219_v21 = vsub.s32 %v904_v17, %v218_v14  ;;  %v233_v23 = vsub.s32 %v919_v34, %v232_v15  ;;  %v257_v24 = vsel %vm256_vm11, 1, %v773_v10 }
  0x66   :  { %v245_v26 = vshrl.u32 %v244_v18, 4  ;;  %v258_v27 = vadd.s32 %v958_v9, %v257_v24  ;;  %vm270_vm3 = vc.u32 %v970_v28, 2216757314  ;;  %v78_v9 = vadd.s32 120, %v838_v2 }
  0x67   :  { %vm428_vm12 = vcmp.ge.s32.totalorder %v407_v20, %v888_v48  ;;  %vm328_vm13 = vcmp.ne.s32.totalorder %v219_v21, 0  ;;  %vm329_vm14 = vcmp.ne.s32.totalorder %v233_v23, 0  ;;  %vm344_vm15 = vcmp.lt.s32.totalorder %v219_v21, 0 }
  0x68   :  { %v592_v19 = vsel %vm428_vm12, 1.0, %v771_v1  ;;  %vm345_vm0 = vcmp.lt.s32.totalorder %v233_v23, 0  ;;  %vm360_vm1 = vmand %vm344_vm15, %vm328_vm13  ;;  %v376_v17 = vadd.s32 31, %v219_v21  ;;  %v377_v30 = vadd.s32 31, %v233_v23 }
  0x69   :  { %v492_v31 = vmul.f32 %v592_v19, %v476_v25  ;;  %vm361_vm2 = vmand %vm345_vm0, %vm329_vm14  ;;  %v246_v32 = vmul.u32 31, %v245_v26  ;;  %v259_v33 = vshrl.u32 %v258_v27, 4  ;;  %v271_v37 = vsel %vm270_vm3, 1, %v773_v10  ;;  %v481_v19 = vld [vmem:[#allocation8 + $0x60] sm:$0xff] }
  0x6a   :  { %v392_v34 = vsel %vm360_vm1, %v376_v17, %v219_v21  ;;  %v393_v36 = vsel %vm361_vm2, %v377_v30, %v233_v23  ;;  %v272_v49 = vadd.s32 %v971_v29, %v271_v37 }
  0x6b   :  { %v504_v40 = vpack.c.bf16 %v492_v31, %v491_v12  ;;  %v408_v41 = vadd.s32 1, %v392_v34  ;;  %v409_v42 = vadd.s32 1, %v393_v36  ;;  %v247_v43 = vsub.s32 %v922_v35, %v246_v32  ;;  %v482_v36 = vld [vmem:[#allocation8 + $0x68] sm:$0xff] }
  0x6c   :  { %v260_v47 = vmul.u32 31, %v259_v33  ;;  %v982_v50 = vmul.u32.u64.low 2216757314, %v948_v59  ;;  %v983_v51 = vmul.u32.u64.high 2216757314, %v948_v59, %v982_v50  ;;  %v273_v57 = vshrl.u32 %v272_v49, 4 }
  0x6d   :  { %618 = vmatpush3.bf16.xpose.msra.mxu0 %v504_v40  ;;  %vm429_vm4 = vcmp.ge.s32.totalorder %v408_v41, %v888_v48  ;;  %vm430_vm5 = vcmp.ge.s32.totalorder %v409_v42, %v888_v48  ;;  %vm330_vm6 = vcmp.ne.s32.totalorder %v247_v43, 0  ;;  %vm346_vm7 = vcmp.lt.s32.totalorder %v247_v43, 0 }
  0x6e   :  { %619 = vmatprep.subr.bf16.mxu0 %v771_v1  ;;  %v593_v35 = vsel %vm429_vm4, 1.0, %v771_v1  ;;  %v594_v52 = vsel %vm430_vm5, 1.0, %v771_v1  ;;  %v261_v53 = vsub.s32 %v930_v44, %v260_v47  ;;  %vm362_vm8 = vmand %vm346_vm7, %vm330_vm6  ;;  %v378_v54 = vadd.s32 31, %v247_v43 }
  0x6f   :  { %v493_v22 = vmul.f32 %v593_v35, %v477_v45  ;;  %v494_v56 = vmul.f32 %v594_v52, %v478_v46  ;;  %vm284_vm9 = vc.u32 %v982_v50, 2216757314  ;;  %v274_v63 = vmul.u32 31, %v273_v57  ;;  %v483_v50 = vld [vmem:[#allocation8 + $0x70] sm:$0xff]  ;;  %v484_v52 = vld [vmem:[#allocation8 + $0x78] sm:$0xff] }
  0x70   :  { %vm331_vm10 = vcmp.ne.s32.totalorder %v261_v53, 0  ;;  %vm347_vm11 = vcmp.lt.s32.totalorder %v261_v53, 0  ;;  %v379_v58 = vadd.s32 31, %v261_v53  ;;  %v394_v60 = vsel %vm362_vm8, %v378_v54, %v247_v43  ;;  %v509_v57 = vld [vmem:[#allocation6] sm:$0xff] }
  0x71   :  { %v505_v61 = vpack.c.bf16 %v494_v56, %v493_v22  ;;  %vm363_vm12 = vmand %vm347_vm11, %vm331_vm10  ;;  %v410_v62 = vadd.s32 1, %v394_v60  ;;  %v285_v0 = vsel %vm284_vm9, 1, %v773_v10  ;;  %v275_v8 = vsub.s32 %v943_v55, %v274_v63  ;;  %v601_v60 = vld [vmem:[%s1041_s3] ss:$0 sm:$0xff] }
  0x72   :  { %v395_v3 = vsel %vm363_vm12, %v379_v58, %v261_v53  ;;  %v286_v44 = vadd.s32 %v983_v51, %v285_v0  ;;  %v994_v5 = vmul.u32.u64.low 2216757314, %v977_v38  ;;  %v995_v6 = vmul.u32.u64.high 2216757314, %v977_v38, %v994_v5 }
  0x73   :  { %v411_v7 = vadd.s32 1, %v395_v3  ;;  %vm431_vm13 = vcmp.ge.s32.totalorder %v410_v62, %v888_v48  ;;  %vm332_vm0 = vcmp.ne.s32.totalorder %v275_v8, 0  ;;  %vm348_vm1 = vcmp.lt.s32.totalorder %v275_v8, 0 }
  0x74   :  { %v595_v11 = vsel %vm431_vm13, 1.0, %v771_v1  ;;  %v287_v14 = vshrl.u32 %v286_v44, 4  ;;  %vm298_vm14 = vc.u32 %v994_v5, 2216757314  ;;  %vm364_vm2 = vmand %vm348_vm1, %vm332_vm0  ;;  %v380_v55 = vadd.s32 31, %v275_v8 }
  0x75   :  { %620 = vmatpush3.bf16.xpose.msra.mxu0 %v505_v61  ;;  %vm432_vm15 = vcmp.ge.s32.totalorder %v411_v7, %v888_v48  ;;  %v495_v15 = vmul.f32 %v595_v11, %v479_v4  ;;  %v299_v2 = vsel %vm298_vm14, 1, %v773_v10  ;;  %v510_v58 = vpack.c.bf16 %v509_v57, %v509_v57 }
  0x76   :  { %621 = vmatprep.subr.bf16.mxu0 %v771_v1  ;;  %v596_v39 = vsel %vm432_vm15, 1.0, %v771_v1  ;;  %v288_v16 = vmul.u32 31, %v287_v14  ;;  %v300_v18 = vadd.s32 %v995_v6, %v299_v2  ;;  %v396_v24 = vsel %vm364_vm2, %v380_v55, %v275_v8 }
  0x77   :  { %v496_v12 = vmul.f32 %v596_v39, %v480_v13  ;;  %v1006_v20 = vmul.u32.u64.low 2216757314, %v78_v9  ;;  %v1007_v21 = vmul.u32.u64.high 2216757314, %v78_v9, %v1006_v20  ;;  %v412_v26 = vadd.s32 1, %v396_v24 }
  0x78   :  { %v289_v23 = vsub.s32 %v948_v59, %v288_v16  ;;  %v301_v27 = vshrl.u32 %v300_v18, 4 }
  0x79   :  { %v506_v25 = vpack.c.bf16 %v496_v12, %v495_v15  ;;  %vm312_vm3 = vc.u32 %v1006_v20, 2216757314  ;;  %vm433_vm7 = vcmp.ge.s32.totalorder %v412_v26, %v888_v48 }
  0x7a   :  { %vm333_vm4 = vcmp.ne.s32.totalorder %v289_v23, 0  ;;  %vm349_vm5 = vcmp.lt.s32.totalorder %v289_v23, 0  ;;  %v381_v28 = vadd.s32 31, %v289_v23  ;;  %v313_v29 = vsel %vm312_vm3, 1, %v773_v10 }
  0x7b   :  { %vm365_vm6 = vmand %vm349_vm5, %vm333_vm4  ;;  %v302_v17 = vmul.u32 31, %v301_v27  ;;  %v314_v30 = vadd.s32 %v1007_v21, %v313_v29  ;;  %v597_v59 = vsel %vm433_vm7, 1.0, %v771_v1 }
  0x7c   :  { %v397_v31 = vsel %vm365_vm6, %v381_v28, %v289_v23  ;;  %v497_v37 = vmul.f32 %v597_v59, %v481_v19 }
  0x7d   :  { %622 = vmatpush3.bf16.xpose.msra.mxu0 %v506_v25  ;;  %v413_v32 = vadd.s32 1, %v397_v31  ;;  %v303_v33 = vsub.s32 %v977_v38, %v302_v17  ;;  %v315_v34 = vshrl.u32 %v314_v30, 4 }
  0x7e   :  { %623 = vmatprep.subr.bf16.mxu0 %v771_v1 }
  0x7f   :  { %vm434_vm8 = vcmp.ge.s32.totalorder %v413_v32, %v888_v48  ;;  %v316_v10 = vmul.u32 31, %v315_v34  ;;  %vm334_vm9 = vcmp.ne.s32.totalorder %v303_v33, 0  ;;  %vm350_vm10 = vcmp.lt.s32.totalorder %v303_v33, 0 }
  0x80   :  { %v598_v40 = vsel %vm434_vm8, 1.0, %v771_v1  ;;  %vm366_vm11 = vmand %vm350_vm10, %vm334_vm9  ;;  %v382_v41 = vadd.s32 31, %v303_v33 }
  0x81   :  { %v498_v42 = vmul.f32 %v598_v40, %v482_v36  ;;  %v317_v43 = vsub.s32 %v78_v9, %v316_v10 }
  0x82   :  { %v398_v45 = vsel %vm366_vm11, %v382_v41, %v303_v33 }
  0x83   :  { %v507_v46 = vpack.c.bf16 %v498_v42, %v497_v37  ;;  %vm335_vm12 = vcmp.ne.s32.totalorder %v317_v43, 0  ;;  %vm351_vm13 = vcmp.lt.s32.totalorder %v317_v43, 0  ;;  %v383_v38 = vadd.s32 31, %v317_v43 }
  0x84   :  { %vm367_vm14 = vmand %vm351_vm13, %vm335_vm12  ;;  %v414_v47 = vadd.s32 1, %v398_v45 }
  0x85   :  { %624 = vmatpush3.bf16.xpose.msra.mxu0 %v507_v46  ;;  %v399_v49 = vsel %vm367_vm14, %v383_v38, %v317_v43 }
  0x86   :  { %625 = vmatprep.subr.bf16.mxu0 %v771_v1  ;;  %v415_v51 = vadd.s32 1, %v399_v49  ;;  %vm435_vm15 = vcmp.ge.s32.totalorder %v414_v47, %v888_v48 }
  0x87   :  { %v599_v35 = vsel %vm435_vm15, 1.0, %v771_v1 }
  0x88   :  { %vm436_vm0 = vcmp.ge.s32.totalorder %v415_v51, %v888_v48  ;;  %v499_v53 = vmul.f32 %v599_v35, %v483_v50 }
  0x89   :  { %v600_v54 = vsel %vm436_vm0, 1.0, %v771_v1 }
  0x8a   :  { %v500_v22 = vmul.f32 %v600_v54, %v484_v52 }
  0x8c   :  { %v508_v56 = vpack.c.bf16 %v500_v22, %v499_v53 }
  0x8e   :  { %626 = vmatpush3.bf16.xpose.msra.mxu0 %v508_v56 }
  0x95   :  { %628 = vmatmul.mubr.bf16.vlgmr.msra.gmra.mrb[0].mxu0 %v510_v58 }
 0x168   :  { %v546_v61 = vpop.f32.mrb[0].mxu0 }
 0x169   :  { %v565_v62 = vadd.f32 %v601_v60, %v546_v61  ;;  %v629_v63 = vpop.f32.mrb[1].mxu0 }
 0x16a   :  { %v549_v0 = vpop.f32.mrb[2].mxu0 }
 0x16b   :  { %v566_v48 = vmax.f32 %v565_v62, 0.0  ;;  %v630_v3 = vpop.f32.mrb[3].mxu0 }
 0x16d   :  { %567 = vst [vmem:[#allocation9] sm:$0xff] %v566_v48 }
 0x16e   :  { %749 = shalt.err (!%p746_p0)
}
 0x16f   :  { %s750_s3 = scalar_lea.hbm %s1042_s4, 128 }
 0x170   :  { %p751_p1 = scmp.ne.s32.totalorder %s1042_s4, %s750_s3  ;;  %p754_p2 = scmp.lt.u32.totalorder %s750_s3, %s1042_s4 }
 0x172   :  { %p756_p3 = pnand %p754_p2, %p751_p1 }
 0x174   :  { %759 = shalt.err (!%p756_p3)
}
 0x175   :  { %577 = dma.vmem_to_hbm [thread:$0]  %s575_s28, 128, %s1042_s4, [#allocation5]  }
 0x176   :  { %764 = dma.done.wait [#allocation5], 128  }
 0x177   :  { %765 = vsyncadd [#allocation5], 4294967168 }
 0x178   :  { %581 = vsyncpa [#allocation4], 1 }
 0x179   :  { %582 = vsyncpa [#allocation7], 1 }
 0x17a   :  { %583 = vsyncpa [#allocation5], 1 }

</bundles_post_ra>
